<compile_context>
chip_gen: v5e
topology: v5e:2x2
jax: 0.10.0
libtpu: 0.0.40
codegen_flags: <defaults>
</compile_context>

<pallas_src>
import jax
import jax.numpy as jnp
from jax.experimental import pallas as pl
from jax.experimental.pallas import tpu as pltpu


# Tunables -------------------------------------------------------------------
_LANE_TILE = 16384        # 64 KiB int32 lane tile for the gridded splat path
_FUSE_MAX = 1 << 20       # fuse both id splats into one call up to 4 MiB each


# ----------------------------------------------------------------------------
# Kernel bodies
# ----------------------------------------------------------------------------
def _fused_splat_kernel(a_ref, b_ref, oa_ref, ob_ref):
    # a_ref / b_ref: (1,) scalars in SMEM.  oa/ob: (1, N_a) / (1, N_b) VMEM,
    # lane-dense.  One pallas_call covers both repeats.
    oa_ref[...] = jnp.full(oa_ref.shape, a_ref[0], oa_ref.dtype)
    ob_ref[...] = jnp.full(ob_ref.shape, b_ref[0], ob_ref.dtype)


def _splat_kernel(x_ref, o_ref):
    # x_ref: (1,) scalar in SMEM.  o_ref: (1, TILE) lane-dense VMEM block.
    o_ref[...] = jnp.full(o_ref.shape, x_ref[0], o_ref.dtype)


def _tile_rows_kernel(x_ref, o_ref):
    # General fallback (k > 1, n > 1): sublane broadcast of one [1, K] row.
    o_ref[...] = jnp.broadcast_to(x_ref[...], o_ref.shape)


# ----------------------------------------------------------------------------
# Wrappers
# ----------------------------------------------------------------------------
def _smem_spec():
    return pl.BlockSpec(memory_space=pltpu.MemorySpace.SMEM)


def _fused_scalar_repeat(a, b, na, nb):
    """Repeat two length-1 id vectors na / nb times with ONE pallas_call."""
    oa, ob = pl.pallas_call(
        _fused_splat_kernel,
        out_shape=(jax.ShapeDtypeStruct((1, na), a.dtype),
                   jax.ShapeDtypeStruct((1, nb), b.dtype)),
        in_specs=[_smem_spec(), _smem_spec()],
        out_specs=(pl.BlockSpec((1, na), lambda: (0, 0)),
                   pl.BlockSpec((1, nb), lambda: (0, 0))),
    )(a, b)
    # (1, N) -> (N,) is lane-major and free (metadata only).
    return oa.reshape(na), ob.reshape(nb)


def _scalar_repeat(x, n):
    """Repeat a length-1 id vector n times -> (n,)."""
    if n <= _LANE_TILE:
        out = pl.pallas_call(
            _splat_kernel,
            out_shape=jax.ShapeDtypeStruct((1, n), x.dtype),
            in_specs=[_smem_spec()],
            out_specs=pl.BlockSpec((1, n), lambda: (0, 0)),
        )(x)
    else:
        # Large-N path: 128-multiple lane tiles, store-roofline bound.
        grid = (pl.cdiv(n, _LANE_TILE),)
        out = pl.pallas_call(
            _splat_kernel,
            out_shape=jax.ShapeDtypeStruct((1, n), x.dtype),
            grid=grid,
            in_specs=[_smem_spec()],
            out_specs=pl.BlockSpec((1, _LANE_TILE), lambda i: (0, i)),
            compiler_params=pltpu.CompilerParams(
                dimension_semantics=("parallel",)),
        )(x)
    return out.reshape(n)


def _vector_repeat(x, n):
    """General fallback: repeat a length-k (k>1) vector n (>1) times."""
    # TODO(synk): not lane-dense for k < 128; unused by the real workload
    # (ids are length-1), kept only for full torch.repeat() generality.
    k = int(x.shape[0])
    out = pl.pallas_call(
        _tile_rows_kernel,
        out_shape=jax.ShapeDtypeStruct((n, k), x.dtype),
        in_specs=[pl.BlockSpec((1, k), lambda: (0, 0))],
        out_specs=pl.BlockSpec((n, k), lambda: (0, 0)),
    )(x.reshape(1, k))
    return out.reshape(n * k)


def pallas_repeat(x, n):
    """Equivalent of torch.Tensor.repeat(n) for a 1-D tensor x."""
    k = int(x.shape[0])
    n = int(n)
    if n == 0 or k == 0:
        return jnp.zeros((n * k,), x.dtype)
    if n == 1:
        return x                      # repeat(1): values unchanged
    if k == 1:
        return _scalar_repeat(x, n)
    return _vector_repeat(x, n)


def _repeat_two(a, na, b, nb):
    """Fuse the module's two id repeats into one kernel launch when possible."""
    na, nb = int(na), int(nb)
    if (int(a.shape[0]) == 1 and int(b.shape[0]) == 1
            and 0 < na <= _FUSE_MAX and 0 < nb <= _FUSE_MAX):
        return _fused_scalar_repeat(a, b, na, nb)
    return pallas_repeat(a, na), pallas_repeat(b, nb)


# ----------------------------------------------------------------------------
# FlatInput forward semantics (dict in -> dict out); mirrors the torch module.
# ----------------------------------------------------------------------------
class FlatInput:
    def __init__(self, data_mode, info, num_users, num_items):
        self.data_mode = data_mode
        self.info = info
        self.num_users = num_users
        self.num_items = num_items

    def __call__(self, inp):
        inp = dict(inp)  # shallow copy; mutate keys like the torch module
        if self.data_mode == 'user':
            inp['user'], inp['target_user'] = _repeat_two(
                inp['user'], inp['item'].shape[0],
                inp['target_user'], inp['target_item'].shape[0])
            if self.info == 1:
                if 'user_profile' in inp:
                    inp['user_profile'] = inp['user_profile'].reshape(1, -1)
                    # NOTE: this tile-by-zero guard matches the original torch
                    # module verbatim (repeat(0, 1) -> empty (0, D)).
                    if inp['item'].shape[0] == 0 and inp['target_item'].shape[0] == 0:
                        inp['user_profile'] = jnp.tile(
                            inp['user_profile'], (inp['item'].shape[0], 1))
                inp.pop('target_user_profile', None)
                inp.pop('item_attr', None)
                inp.pop('target_item_attr', None)
            else:
                inp.pop('user_profile', None)
                inp.pop('target_user_profile', None)
                inp.pop('item_attr', None)
                inp.pop('target_item_attr', None)
        elif self.data_mode == 'item':
            inp['item'], inp['target_item'] = _repeat_two(
                inp['item'], inp['user'].shape[0],
                inp['target_item'], inp['target_user'].shape[0])
            if self.info == 1:
                inp.pop('user_profile', None)
                inp.pop('target_user_profile', None)
                if 'item_attr' in inp:
                    inp['item_attr'] = inp['item_attr'].reshape(1, -1)
                    if inp['user'].shape[0] == 0 and inp['target_user'].shape[0] == 0:
                        inp['item_attr'] = jnp.tile(
                            inp['item_attr'], (inp['user'].shape[0], 1))
                inp.pop('target_item_attr', None)
            else:
                inp.pop('user_profile', None)
                inp.pop('target_user_profile', None)
                inp.pop('item_attr', None)
                inp.pop('target_item_attr', None)
        else:
            raise ValueError('Not valid data mode')
        return inp


if __name__ == "__main__":
    key = jax.random.PRNGKey(0)
    k_u, k_i, k_ti, k_p, k_a = jax.random.split(key, 5)

    num_users, num_items = 32, 64
    n_items, n_target_items, profile_dim, attr_dim = 8, 6, 16, 12

    # Per-sample dict as produced by the AAE dataset: scalar-like user id,
    # variable-length item lists, optional side-info vectors.
    inp = {
        'user': jax.random.randint(k_u, (1,), 0, num_users, dtype=jnp.int32),
        'target_user': jax.random.randint(k_u, (1,), 0, num_users, dtype=jnp.int32),
        'item': jax.random.randint(k_i, (n_items,), 0, num_items, dtype=jnp.int32),
        'target_item': jax.random.randint(k_ti, (n_target_items,), 0, num_items,
                                          dtype=jnp.int32),
        'rating': jax.random.normal(k_p, (n_items,), dtype=jnp.float32),
        'target_rating': jax.random.normal(k_p, (n_target_items,), dtype=jnp.float32),
        'user_profile': jax.random.normal(k_p, (profile_dim,), dtype=jnp.float32),
        'target_user_profile': jax.random.normal(k_p, (profile_dim,), dtype=jnp.float32),
        'item_attr': jax.random.normal(k_a, (attr_dim,), dtype=jnp.float32),
        'target_item_attr': jax.random.normal(k_a, (attr_dim,), dtype=jnp.float32),
    }

    # ---- 'user' branch (exercises the fused SMEM-splat kernel) ----
    flat = FlatInput(data_mode='user', info=1, num_users=num_users,
                     num_items=num_items)
    out = flat(inp)
    jax.tree_util.tree_map(jax.block_until_ready, out)

    ref_user = jnp.tile(inp['user'], n_items)
    ref_tuser = jnp.tile(inp['target_user'], n_target_items)
    assert out['user'].shape == (n_items,)
    assert out['target_user'].shape == (n_target_items,)
    assert jnp.array_equal(out['user'], ref_user)
    assert jnp.array_equal(out['target_user'], ref_tuser)
    assert out['user_profile'].shape == (1, profile_dim)
    assert 'target_user_profile' not in out
    assert 'item_attr' not in out
    assert 'target_item_attr' not in out

    # ---- 'item' branch ----
    flat_item = FlatInput(data_mode='item', info=1, num_users=num_users,
                          num_items=num_items)
    out_i = flat_item(dict(inp))
    jax.tree_util.tree_map(jax.block_until_ready, out_i)
    assert jnp.array_equal(out_i['item'], jnp.tile(inp['item'], 1))
    assert jnp.array_equal(out_i['target_item'], jnp.tile(inp['target_item'], 1))
    assert out_i['item_attr'].shape == (1, attr_dim)
    assert 'user_profile' not in out_i

    # ---- direct kernel checks ----
    uid = inp['user']
    # small single-splat (no grid)
    r50 = _scalar_repeat(uid, 50)
    assert jnp.array_equal(r50, jnp.full((50,), uid[0], uid.dtype))
    # large single-splat (gridded lane tiles, ragged last block)
    n_big = 20000
    rbig = _scalar_repeat(uid, n_big)
    jax.block_until_ready(rbig)
    assert jnp.array_equal(rbig, jnp.full((n_big,), uid[0], uid.dtype))
    # general (k>1, n>1) fallback
    vec = jnp.arange(5, dtype=jnp.int32)
    rv = _vector_repeat(vec, 3)
    assert jnp.array_equal(rv, jnp.tile(vec, 3))
    # fused pair
    fa, fb = _fused_scalar_repeat(inp['user'], inp['target_user'], 7, 9)
    assert jnp.array_equal(fa, jnp.tile(inp['user'], 7))
    assert jnp.array_equal(fb, jnp.tile(inp['target_user'], 9))

    print("KERNEL_OK")
</pallas_src>

<mosaic_0001>
module attributes {stable_mosaic.version = 11 : i64} {
  func.func @_fused_splat_kernel(%arg0: memref<1xi32, #tpu.memory_space<smem>>, %arg1: memref<1xi32, #tpu.memory_space<smem>>, %arg2: memref<1x8xi32, #tpu.memory_space<vmem>>, %arg3: memref<1x6xi32, #tpu.memory_space<vmem>>) attributes {dimension_semantics = [], scalar_prefetch = 0 : i64, scratch_operands = 0 : i64, tpu.core_type = #tpu.core_type<tc>} {
    %c0 = arith.constant 0 : index
    %0 = memref.load %arg0[%c0] : memref<1xi32, #tpu.memory_space<smem>>
    %1 = vector.broadcast %0 : i32 to vector<1x8xi32>
    %c0_0 = arith.constant 0 : index
    %c0_1 = arith.constant 0 : index
    %2 = vector.load %arg2[%c0_0, %c0_1] : memref<1x8xi32, #tpu.memory_space<vmem>>, vector<1x8xi32>
    tpu.vector_store %arg2[%c0_0, %c0_1], %1 {strides = array<i32>} : memref<1x8xi32, #tpu.memory_space<vmem>>, vector<1x8xi32>,
    %c0_2 = arith.constant 0 : index
    %3 = memref.load %arg1[%c0_2] : memref<1xi32, #tpu.memory_space<smem>>
    %4 = vector.broadcast %3 : i32 to vector<1x6xi32>
    %c0_3 = arith.constant 0 : index
    %c0_4 = arith.constant 0 : index
    %5 = vector.load %arg3[%c0_3, %c0_4] : memref<1x6xi32, #tpu.memory_space<vmem>>, vector<1x6xi32>
    tpu.vector_store %arg3[%c0_3, %c0_4], %4 {strides = array<i32>} : memref<1x6xi32, #tpu.memory_space<vmem>>, vector<1x6xi32>,
    return
  }
}

</mosaic_0001>

<bundles_post_ra>
// kernel: tpu_custom_call.1
= control target key start
LH: loop header
LB: loop body
LE: loop exit
PB: predicated region body
PF: predicated region fallthrough
CT: control target
= control target key end

     0   :  { %11 = vsyncpa [#allocation5], 0  ;;  %vm19_vm0 = vcmask 57344   ;;  %vm23_vm1 = vcmask 40960   ;;  %s145_s0 = inlined_call_operand.<no memory space> [shape: s32[1], index: 0, kind: input, shape index: {}]   ;;  %s146_s1 = inlined_call_operand.<no memory space> [shape: s32[1], index: 1, kind: input, shape index: {}]   ;;  %s147_s2 = inlined_call_operand.hbm [shape: s32[1,8], index: 2, kind: output, shape index: {0}]   ;;  %s148_s3 = inlined_call_operand.hbm [shape: s32[1,6], index: 3, kind: output, shape index: {1}]  }
   0x1   :  { %v18_v0 = vstv %s145_s0  ;;  %v22_v1 = vstv %s146_s1  ;;  %s32_s18 = sshll.u32 %s147_s2, 4  ;;  %s33_s18 = int_to_ptr.hbm [resolvable:$true] %s32_s18 }
   0x2   :  { %12 = vsyncpa [#allocation7], 0  ;;  %20 = vst.msk [vmem:[#allocation4] sm:$0x1] %vm19_vm0, %v18_v0  ;;  %s111_s19 = smov [#allocation4]   ;;  %s112_s21 = smov [#allocation6]  }
   0x3   :  { %s30_s20 = sshll.u32 %s111_s19, 4  ;;  %24 = vst.msk [vmem:[#allocation6] sm:$0x1] %vm23_vm1, %v22_v1  ;;  %s41_s0 = sshll.u32 %s112_s21, 4  ;;  %s31_s20 = int_to_ptr.vmem [resolvable:$true] %s30_s20  ;;  %s42_s0 = int_to_ptr.vmem [resolvable:$true] %s41_s0 }
   0x4   :  { %35 = dma.vmem_to_hbm [thread:$0]  %s31_s20, 16, %s33_s18, [#allocation5]  }
   0x5   :  { %s43_s24 = sshll.u32 %s148_s3, 4  ;;  %s44_s24 = int_to_ptr.hbm [resolvable:$true] %s43_s24 }
   0x6   :  { %46 = dma.vmem_to_hbm [thread:$0]  %s42_s0, 16, %s44_s24, [#allocation7]  }
   0x7   :  { %107 = dma.done.wait [#allocation5], 16  }
   0x8   :  { %108 = vsyncadd [#allocation5], 4294967280 }
   0x9   :  { %109 = dma.done.wait [#allocation7], 16  }
   0xa   :  { %110 = vsyncadd [#allocation7], 4294967280 }
   0xb   :  { %55 = vsyncpa [#allocation5], 1 }
   0xc   :  { %56 = vsyncpa [#allocation7], 1 }

</bundles_post_ra>
